<compile_context>
chip_gen: v7x
topology: tpu7x:2x2x1
jax: 0.10.0
libtpu: 0.0.40
codegen_flags: <defaults>
</compile_context>

<pallas_src>
import jax
import jax.numpy as jnp
from jax.experimental import pallas as pl
from jax.experimental.pallas import tpu as pltpu


_LANE = 128
_SUBLANE = 8


def _round_up(x, m):
    return ((x + m - 1) // m) * m


def _cdiv(a, b):
    return (a + b - 1) // b


def _vmem_budget_bytes():
    """~80% of this generation's physical VMEM (fallback: 64 MiB = v7x)."""
    try:
        cap = int(pltpu.get_tpu_info().vmem_capacity_bytes)
    except Exception:
        cap = 64 * 1024 * 1024
    return int(cap * 0.8)


def _w_block_spec(D, single_buffer):
    """Grid-invariant W block; single-buffered when it is big enough to matter."""
    idx = lambda i, j: (0, 0)
    if single_buffer and hasattr(pl, "Buffered"):
        try:
            return pl.BlockSpec((D, D), idx, pipeline_mode=pl.Buffered(1))
        except TypeError:  # BlockSpec without pipeline_mode support
            pass
    return pl.BlockSpec((D, D), idx)


def _fused_carry_kernel(semb_ref, w_ref, trg_ref, out_ref, trans_ref):
    # trans = semb @ W computed once per batch tile (first vocab tile only),
    # f32 accumulation, stored ONCE as bf16 in VMEM scratch and reused across
    # the vocab axis.  Requires the vocab axis to be the innermost, serially
    # iterated ("arbitrary") grid axis.
    @pl.when(pl.program_id(1) == 0)
    def _():
        trans_ref[...] = jnp.dot(
            semb_ref[...], w_ref[...],
            preferred_element_type=jnp.float32).astype(trans_ref.dtype)

    # out_tile = trans @ trg_tile ; trg is pre-transposed to (D, Vt) in the
    # wrapper, so this is a plain MXU matmul (no in-kernel transpose).
    out_ref[...] = jnp.dot(
        trans_ref[...], trg_ref[...],
        preferred_element_type=jnp.float32).astype(out_ref.dtype)


def _vocab_gemm_kernel(trans_ref, trg_ref, out_ref):
    # Small-batch path: single GEMM over vocab tiles.
    out_ref[...] = jnp.dot(
        trans_ref[...], trg_ref[...],
        preferred_element_type=jnp.float32).astype(out_ref.dtype)


def make_translator(src_m, trg_m, W, *, max_tile_b=512, tile_n_target=1024,
                    compute_dtype=jnp.bfloat16, out_dtype=jnp.float32):
    """Returns a jitted forward(x_idx) -> (B, V_trg) scores (f32 by default;
    pass out_dtype=jnp.bfloat16 if the consumer tolerates bf16 scores)."""
    src_m = jnp.asarray(src_m, jnp.float32)
    trg_m = jnp.asarray(trg_m, jnp.float32)
    W = jnp.asarray(W, jnp.float32)

    D = src_m.shape[1]
    Vt = trg_m.shape[0]
    itemsize = jnp.dtype(compute_dtype).itemsize
    out_itemsize = jnp.dtype(out_dtype).itemsize

    # ---- one-time weight prep (no per-call HBM cast / transpose passes) ----
    src_lo = src_m.astype(compute_dtype)          # (Vs, D) bf16 table
    w_lo = W.astype(compute_dtype)                # (D, D)  bf16

    budget = _vmem_budget_bytes()

    # Single-buffer W when its double-buffered footprint would matter.
    w_single = (2 * D * D * itemsize) > (8 << 20)
    w_buffers = 1 if w_single else 2
    # TODO(synk): K-tile the first matmul (grid axis over D with accumulation)
    # when even a single-buffered bf16 W exceeds the VMEM budget (huge D).

    max_tile_b = _round_up(max(_SUBLANE, min(int(max_tile_b), 4096)), _SUBLANE)

    def _fixed_bytes(tb):
        # W (w_buffers) + semb (double-buffered) + bf16 trans scratch.
        return (w_buffers * D * D + 2 * tb * D + tb * D) * itemsize

    def _per_col_bytes(tb):
        # trg column (double-buffered bf16) + out column (double-buffered).
        return 2 * D * itemsize + 2 * tb * out_itemsize

    # Shrink the batch tile until the fixed footprint + one lane-width vocab
    # tile fits the budget.
    while (max_tile_b > _SUBLANE and
           _fixed_bytes(max_tile_b) + _LANE * _per_col_bytes(max_tile_b) > budget):
        max_tile_b = _round_up(max_tile_b // 2, _SUBLANE)

    # Vocab tile: cap by VMEM budget, then balance padding across tiles.
    max_tile_n = (budget - _fixed_bytes(max_tile_b)) // _per_col_bytes(max_tile_b)
    max_tile_n = max(_LANE, (max_tile_n // _LANE) * _LANE)
    tn_target = max(_LANE, min(int(tile_n_target), max_tile_n))
    n_vtiles = max(1, _cdiv(Vt, tn_target))
    tile_n = _round_up(_cdiv(Vt, n_vtiles), _LANE)
    Vtp = n_vtiles * tile_n

    trg_lo_t = trg_m.astype(compute_dtype).T      # (D, Vt), one-time transpose
    if Vtp != Vt:
        trg_lo_t = jnp.pad(trg_lo_t, ((0, 0), (0, Vtp - Vt)))

    vmem_limit = int(budget)

    @jax.jit
    def forward(x_idx):
        x_idx = jnp.atleast_1d(jnp.asarray(x_idx, jnp.int32))
        B = x_idx.shape[0]

        # Embedding gather in bf16 (tiny: B x D vs the trg / output streams).
        # TODO(synk): for very large B fuse the gather into the kernel via a
        # scalar-prefetched row index_map instead of materializing semb.
        semb = jnp.take(src_lo, x_idx, axis=0)

        if B <= max_tile_b:
            nb = 1
            tile_b = _round_up(B, _SUBLANE)       # no 16x padding for small B
        else:
            nb = _cdiv(B, max_tile_b)
            tile_b = _round_up(_cdiv(B, nb), _SUBLANE)
        Bp = nb * tile_b
        if Bp != B:
            semb = jnp.pad(semb, ((0, Bp - B), (0, 0)))

        flops_mm2 = 2 * Bp * D * Vtp
        out_bytes = Bp * Vtp * out_itemsize

        if nb == 1:
            # Small batch: trans via a tiny XLA matmul; kernel is a pure
            # vocab-tiled GEMM -> vocab axis "parallel" (uses both v7x TCs),
            # no scratch / carry.
            trans = jnp.dot(semb, w_lo,
                            preferred_element_type=jnp.float32
                            ).astype(compute_dtype)
            cost = pl.CostEstimate(
                flops=flops_mm2, transcendentals=0,
                bytes_accessed=(Bp * D + D * Vtp) * itemsize + out_bytes)
            out = pl.pallas_call(
                _vocab_gemm_kernel,
                out_shape=jax.ShapeDtypeStruct((Bp, Vtp), out_dtype),
                grid_spec=pltpu.PrefetchScalarGridSpec(
                    num_scalar_prefetch=0,
                    grid=(n_vtiles,),
                    in_specs=[
                        pl.BlockSpec((tile_b, D), lambda j: (0, 0)),   # trans
                        pl.BlockSpec((D, tile_n), lambda j: (0, j)),   # trg^T
                    ],
                    out_specs=pl.BlockSpec((tile_b, tile_n), lambda j: (0, j)),
                ),
                compiler_params=pltpu.CompilerParams(
                    dimension_semantics=("parallel",),
                    vmem_limit_bytes=vmem_limit,
                ),
                cost_estimate=cost,
            )(trans, trg_lo_t)
        else:
            # Large batch: fused kernel; trans computed once per batch tile
            # into a bf16 VMEM scratch and reused across the vocab axis.
            cost = pl.CostEstimate(
                flops=2 * Bp * D * D + flops_mm2, transcendentals=0,
                bytes_accessed=(Bp * D + D * D + nb * D * Vtp) * itemsize
                + out_bytes)
            out = pl.pallas_call(
                _fused_carry_kernel,
                out_shape=jax.ShapeDtypeStruct((Bp, Vtp), out_dtype),
                grid_spec=pltpu.PrefetchScalarGridSpec(
                    num_scalar_prefetch=0,
                    grid=(nb, n_vtiles),
                    in_specs=[
                        pl.BlockSpec((tile_b, D), lambda i, j: (i, 0)),  # semb
                        _w_block_spec(D, w_single),                      # W
                        pl.BlockSpec((D, tile_n), lambda i, j: (0, j)),  # trg^T
                    ],
                    out_specs=pl.BlockSpec((tile_b, tile_n),
                                           lambda i, j: (i, j)),
                    scratch_shapes=[pltpu.VMEM((tile_b, D), compute_dtype)],
                ),
                compiler_params=pltpu.CompilerParams(
                    # Batch tiles are independent (megacore-shardable).  The
                    # vocab axis MUST stay innermost + "arbitrary": the trans
                    # scratch is carried across it.
                    dimension_semantics=("parallel", "arbitrary"),
                    vmem_limit_bytes=vmem_limit,
                ),
                cost_estimate=cost,
            )(semb, w_lo, trg_lo_t)

        return out[:B, :Vt]

    return forward


def _orthogonal_init(key, n):
    """Deterministic orthogonal matrix (same spirit as nn.init.orthogonal_)."""
    a = jax.random.normal(key, (n, n), dtype=jnp.float32)
    q, r = jnp.linalg.qr(a)
    d = jnp.diag(r)
    return (q * jnp.where(d >= 0.0, 1.0, -1.0)[None, :]).astype(jnp.float32)


if __name__ == "__main__":
    key = jax.random.PRNGKey(0)
    k_src, k_trg, k_w, k_x1, k_x2 = jax.random.split(key, 5)

    V_src, V_trg, D = 50, 300, 32      # small vocabularies, hidden dim 32
    src_m = jax.random.normal(k_src, (V_src, D), dtype=jnp.float32)
    trg_m = jax.random.normal(k_trg, (V_trg, D), dtype=jnp.float32)
    W = _orthogonal_init(k_w, D)

    bf = jnp.bfloat16

    def reference(x):
        # Mirrors the kernel's bf16-input / f32-accumulate / bf16-trans math.
        semb_r = src_m[x].astype(bf)
        trans_r = jnp.dot(semb_r, W.astype(bf),
                          preferred_element_type=jnp.float32).astype(bf)
        return jnp.dot(trans_r, trg_m.astype(bf).T,
                       preferred_element_type=jnp.float32)

    # Path A: decode-sized batch -> single batch tile, vocab axis parallel.
    fwd = make_translator(src_m, trg_m, W)
    x_small = jax.random.randint(k_x1, (8,), 0, V_src, dtype=jnp.int32)
    scores_small = jax.block_until_ready(fwd(x_small))
    assert scores_small.shape == (8, V_trg)
    assert jnp.allclose(scores_small, reference(x_small), atol=2e-2, rtol=2e-2)

    # Path B: multiple batch tiles (tiny tiles here just to exercise the fused
    # scratch-carry kernel and the batch/vocab padding logic at small shapes).
    fwd_tiled = make_translator(src_m, trg_m, W, max_tile_b=16, tile_n_target=128)
    x_big = jax.random.randint(k_x2, (40,), 0, V_src, dtype=jnp.int32)
    scores_big = jax.block_until_ready(fwd_tiled(x_big))
    assert scores_big.shape == (40, V_trg)
    assert jnp.allclose(scores_big, reference(x_big), atol=2e-2, rtol=2e-2)

    # Loose sanity vs the pure-f32 PyTorch forward (bf16 rounding only).
    ref_f32 = (src_m[x_small] @ W) @ trg_m.T
    assert jnp.allclose(scores_small, ref_f32, atol=0.35, rtol=5e-2)

    print("KERNEL_OK")
</pallas_src>

<mosaic_0001>
module attributes {stable_mosaic.version = 11 : i64} {
  func.func @_vocab_gemm_kernel(%arg0: i32, %arg1: memref<8x32xbf16, #tpu.memory_space<vmem>>, %arg2: memref<32x384xbf16, #tpu.memory_space<vmem>>, %arg3: memref<8x384xf32, #tpu.memory_space<vmem>>) attributes {dimension_semantics = [#tpu.dimension_semantics<parallel>], iteration_bounds = array<i64: 1>, scalar_prefetch = 0 : i64, scratch_operands = 0 : i64, tpu.core_type = #tpu.core_type<tc>, window_params = [{pipeline_mode = #tpu.pipeline_mode<synchronous>, transform_indices = @transform_0, window_bounds = array<i64: 8, 32>}, {transform_indices = @transform_1, window_bounds = array<i64: 32, 384>}, {transform_indices = @transform_2, window_bounds = array<i64: 8, 384>}]} {
    %c0 = arith.constant 0 : index
    %c0_0 = arith.constant 0 : index
    %0 = vector.load %arg1[%c0, %c0_0] : memref<8x32xbf16, #tpu.memory_space<vmem>>, vector<8x32xbf16>
    %c0_1 = arith.constant 0 : index
    %c0_2 = arith.constant 0 : index
    %1 = vector.load %arg2[%c0_1, %c0_2] : memref<32x384xbf16, #tpu.memory_space<vmem>>, vector<32x384xbf16>
    %cst = arith.constant dense<0.000000e+00> : vector<8x384xf32>
    %2 = tpu.matmul %0, %1, %cst {dimension_numbers = #tpu.dot_dimension_numbers<[1], [0], [0], [1], [0, 0, 1, 1], [], []>} : vector<8x32xbf16>, vector<32x384xbf16>, vector<8x384xf32> -> vector<8x384xf32>
    %c0_3 = arith.constant 0 : index
    %c0_4 = arith.constant 0 : index
    %3 = vector.load %arg3[%c0_3, %c0_4] : memref<8x384xf32, #tpu.memory_space<vmem>>, vector<8x384xf32>
    tpu.vector_store %arg3[%c0_3, %c0_4], %2 {strides = array<i32>} : memref<8x384xf32, #tpu.memory_space<vmem>>, vector<8x384xf32>,
    return
  }
  func.func @transform_0(%arg0: i32) -> (i32, i32) {
    %c0_i32 = arith.constant 0 : i32
    %c0_i32_0 = arith.constant 0 : i32
    %c0_i32_1 = arith.constant 0 : i32
    return %c0_i32, %c0_i32_0 : i32, i32
  }
  func.func @transform_1(%arg0: i32) -> (i32, i32) {
    %c0_i32 = arith.constant 0 : i32
    %c0_i32_0 = arith.constant 0 : i32
    return %c0_i32, %arg0 : i32, i32
  }
  func.func @transform_2(%arg0: i32) -> (i32, i32) {
    %c0_i32 = arith.constant 0 : i32
    %c0_i32_0 = arith.constant 0 : i32
    return %c0_i32, %arg0 : i32, i32
  }
}

</mosaic_0001>

<bundles_post_ra>
// kernel: forward.1
= control target key start
LH: loop header
LB: loop body
LE: loop exit
PB: predicated region body
PF: predicated region fallthrough
CT: control target
= control target key end

     0   :  { %v211_v1 = vmov 0.0   ;;  %vm212_vm0 = vmmov 0   ;;  %v213_v5 = vmov 0   ;;  %s263_s0 = inlined_call_operand.vmem [shape: bf16[8,32], index: 0, kind: input, shape index: {}]   ;;  %s264_s1 = inlined_call_operand.vmem [shape: bf16[32,384], index: 1, kind: input, shape index: {}]   ;;  %s265_s2 = inlined_call_operand.hbm [shape: f32[8,384], index: 2, kind: output, shape index: {}]  }
   0x1   :  { %v179_v0 = vld [vmem:[%s264_s1 + $0x4] ss:$12 sps:$4 sm:$0xff]   ;;  %167 = vmatprep.subr.bf16.mxu1 %v211_v1  ;;  %v181_v2 = vld [vmem:[%s264_s1 + $0x8] ss:$12 sps:$4 sm:$0xff]   ;;  %171 = vmatprep.mubr.msk.bf16.mxu1 %vm212_vm0, %v211_v1  ;;  %v182_v3 = vld [vmem:[%s264_s1] ss:$12 sps:$4 sm:$0xff]  }
   0x2   :  { %58 = vmatprep.subr.bf16.mxu0 %v179_v0  ;;  %168 = vmatpush3.bf16.msra.mxu1 %v181_v2  ;;  %v183_v4 = vld [vmem:[%s264_s1 + $0x1c] ss:$12 sps:$4 sm:$0xff]   ;;  %v185_v6 = vld [vmem:[%s264_s1 + $0x20] ss:$12 sps:$4 sm:$0xff]   ;;  %v186_v7 = vld [vmem:[%s264_s1 + $0x18] ss:$12 sps:$4 sm:$0xff]  }
   0x3   :  { %90 = vmatprep.mubr.bf16.mxu0 %v213_v5  ;;  %59 = vmatpush1.bf16.msra.mxu0 %v182_v3 }
   0x4   :  { %169 = vmatprep.subr.bf16.mxu1 %v211_v1  ;;  %60 = vmatprep.subr.bf16.mxu0 %v183_v4 }
   0x5   :  { %7 = vsyncpa [#allocation3], 0  ;;  %v13_v8 = vld [vmem:[%s263_s0] sm:$0xf]  ;;  %vm54_vm1 = vcmask 261120   ;;  %s214_s23 = smov [#allocation2]  }
   0x6   :  { %170 = vmatpush3.bf16.msra.mxu1 %v185_v6  ;;  %s148_s24 = sshll.u32 %s214_s23, 4  ;;  %s149_s24 = int_to_ptr.vmem [resolvable:$true] %s148_s24 }
   0x7   :  { %61 = vmatpush1.bf16.msra.mxu0 %v186_v7  ;;  %s187_s1 = scalar_lea.vmem %s149_s24, 384  ;;  %p192_p1 = scmp.lt.s32.totalorder %s149_s24, %s149_s24 }
   0x8   :  { %p188_p0 = scmp.ne.s32.totalorder %s149_s24, %s187_s1  ;;  %p193_p2 = scmp.lt.s32.totalorder %s187_s1, %s187_s1 }
   0x9   :  { %172 = vmatmul.mubr.msk.bf16.vlgmr.msra.gmra.mrb[0].mxu1 %vm54_vm1, %v13_v8 }
   0xa   :  { %162 = vmatmul.mubr.msk.bf16.vlgmr.msra.gmra.mrb[0].mxu0 %vm54_vm1, %v13_v8  ;;  %p194_p3 = por %p193_p2, %p192_p1 }
   0xc   :  { %p195_p4 = pnand %p194_p3, %p188_p0 }
  0xdc   :  { %v133_v9 = vpop.f32.mrb[0].mxu1 }
  0xdd   :  { %141 = vst [vmem:[#allocation2 + $0x10] sm:$0xff] %v133_v9  ;;  %v92_v10 = vpop.f32.mrb[0].mxu0  ;;  %v173_v11 = vpop.f32.mrb[1].mxu1 }
  0xde   :  { %139 = vst [vmem:[#allocation2] sm:$0xff] %v92_v10  ;;  %v94_v12 = vpop.f32.mrb[1].mxu0  ;;  %v136_v13 = vpop.f32.mrb[2].mxu1 }
  0xdf   :  { %140 = vst [vmem:[#allocation2 + $0x8] sm:$0xff] %v94_v12  ;;  %v96_v14 = vpop.f32.mrb[2].mxu0  ;;  %v174_v15 = vpop.f32.mrb[3].mxu1 }
  0xe0   :  { %v97_v16 = vpop.f32.mrb[3].mxu0 }
  0xe1   :  { %198 = shalt.err (!%p195_p4)
}
  0xe2   :  { %s199_s26 = scalar_lea.hbm %s265_s2, 384 }
  0xe3   :  { %p200_p5 = scmp.ne.s32.totalorder %s265_s2, %s199_s26  ;;  %p203_p6 = scmp.lt.u32.totalorder %s199_s26, %s265_s2 }
  0xe5   :  { %p205_p7 = pnand %p203_p6, %p200_p5 }
  0xe7   :  { %208 = shalt.err (!%p205_p7)
}
  0xe8   :  { %151 = dma.vmem_to_hbm [thread:$0]  %s149_s24, 384, %s265_s2, [#allocation3]  }
  0xe9   :  { %209 = dma.done.wait [#allocation3], 384  }
  0xea   :  { %210 = vsyncadd [#allocation3], 4294966912 }
  0xeb   :  { %155 = vsyncpa [#allocation3], 1 }

</bundles_post_ra>
